<compile_context>
chip_gen: v6e
topology: v6e:2x2x1
jax: 0.10.0
libtpu: 0.0.40
codegen_flags: <defaults>
</compile_context>

<pallas_src>
import functools

import jax
import jax.numpy as jnp
import numpy as np
from jax import lax
from jax.experimental import pallas as pl
from jax.experimental.pallas import tpu as pltpu


def ms_loss_kernel(x_ref, t_row_ref, t_col_ref, loss_ref, valid_ref,
                   *, alpha, beta, margin, epsilon, tm, n_actual):
    i = pl.program_id(0)
    r0 = pl.multiple_of(i * tm, tm)

    x_full = x_ref[...]                                   # (N_pad, D) bf16
    x_rows = x_ref[pl.ds(r0, tm), :]                      # (TM, D)   bf16

    # sim[j, k] = <x_{r0+j}, x_k>  -- bf16 MXU, f32 accumulation.
    sim = lax.dot_general(
        x_rows, x_full, (((1,), (1,)), ((), ())),
        preferred_element_type=jnp.float32)               # (TM, N_pad) f32

    t_row = t_row_ref[...]                                # (1, N_pad) int32
    t_anchor = t_col_ref[...]                             # (TM, 1)    int32
    same = (t_anchor == t_row)                            # (TM, N_pad)

    n_pad = sim.shape[1]
    # Exclude padded columns from both positive and negative candidate sets.
    col_valid = lax.broadcasted_iota(jnp.int32, (1, n_pad), 1) < n_actual

    pos_mask = jnp.logical_and(jnp.logical_and(same, sim < 1.0), col_valid)
    neg_mask = jnp.logical_and(jnp.logical_not(same), col_valid)

    inf = jnp.float32(jnp.inf)
    min_pos = jnp.min(jnp.where(pos_mask, sim, inf), axis=1, keepdims=True)
    max_neg = jnp.max(jnp.where(neg_mask, sim, -inf), axis=1, keepdims=True)

    # Hard-mining selections (epsilon margin).  If there are no positives
    # (min_pos = +inf) or no negatives (max_neg = -inf) both selections end
    # up empty, which the validity gate below catches.
    pos_sel = jnp.logical_and(pos_mask, sim - epsilon < max_neg)
    neg_sel = jnp.logical_and(neg_mask, sim + epsilon > min_pos)

    # Fold the selection into the exp argument: masked lanes exp(-inf) -> 0,
    # so no post-exp select and no overflow on unselected lanes.
    sm = sim - margin
    pos_exp = jnp.exp(jnp.where(pos_sel, (-alpha) * sm, -inf))
    neg_exp = jnp.exp(jnp.where(neg_sel, beta * sm, -inf))

    pos_sum = jnp.sum(pos_exp, axis=1, keepdims=True)     # (TM, 1)
    neg_sum = jnp.sum(neg_exp, axis=1, keepdims=True)     # (TM, 1)

    # Anchor is valid iff both hard-mined sets are non-empty (this also
    # covers the "no positives / no negatives at all" case) and it is not a
    # padded row.
    row_ids = r0 + lax.broadcasted_iota(jnp.int32, (tm, 1), 0)
    valid = jnp.logical_and(
        jnp.logical_and(pos_sum > 0.0, neg_sum > 0.0),
        row_ids < n_actual)

    row_loss = (jnp.log(1.0 + pos_sum) * (1.0 / alpha)
                + jnp.log(1.0 + neg_sum) * (1.0 / beta))

    loss_ref[...] = jnp.where(valid, row_loss, 0.0)
    valid_ref[...] = valid.astype(jnp.float32)


def ms_loss_pallas(x, target, alpha=2.0, beta=5.0, margin=0.5, epsilon=0.2):
    """Pallas equivalent of Ms_loss()([x], target)."""
    n, d = x.shape

    # Row-tile size: 128 anchors per block (pad small batches up to a
    # sublane multiple and run a single block).
    if n >= 128:
        tm = 128
    else:
        tm = ((n + 7) // 8) * 8
    n_pad = ((n + tm - 1) // tm) * tm
    num_blocks = n_pad // tm

    # bf16 operands for the MXU (f32 accumulation inside the kernel).
    x_bf16 = jnp.zeros((n_pad, d), jnp.bfloat16).at[:n].set(
        x.astype(jnp.bfloat16))
    t = target.astype(jnp.int32)
    t_pad = jnp.full((n_pad,), -1, jnp.int32).at[:n].set(t)
    t_row = t_pad.reshape(1, n_pad)
    t_col = t_pad.reshape(n_pad, 1)

    kernel = functools.partial(
        ms_loss_kernel,
        alpha=float(alpha), beta=float(beta),
        margin=float(margin), epsilon=float(epsilon),
        tm=tm, n_actual=n)

    cost = pl.CostEstimate(
        flops=2 * n * n * d,
        transcendentals=2 * n * n,
        bytes_accessed=n_pad * d * 2 + n_pad * n_pad * 4 + 2 * n_pad * 4)

    loss_rows, valid_rows = pl.pallas_call(
        kernel,
        out_shape=(jax.ShapeDtypeStruct((n_pad, 1), jnp.float32),
                   jax.ShapeDtypeStruct((n_pad, 1), jnp.float32)),
        grid=(num_blocks,),
        in_specs=[
            # Full x stays resident (needed as the column operand anyway);
            # the anchor slab is sliced inside the kernel.
            pl.BlockSpec((n_pad, d), lambda i: (0, 0)),
            pl.BlockSpec((1, n_pad), lambda i: (0, 0)),
            pl.BlockSpec((tm, 1), lambda i: (i, 0)),
        ],
        out_specs=(pl.BlockSpec((tm, 1), lambda i: (i, 0)),
                   pl.BlockSpec((tm, 1), lambda i: (i, 0))),
        compiler_params=pltpu.CompilerParams(
            dimension_semantics=("parallel",),
            vmem_limit_bytes=48 * 1024 * 1024),
        cost_estimate=cost,
    )(x_bf16, t_row, t_col)

    total = jnp.sum(loss_rows)
    count = jnp.sum(valid_rows)
    # PyTorch reference returns 0 when no anchor contributes.
    return jnp.where(count > 0.0, total / jnp.maximum(count, 1.0),
                     jnp.float32(0.0))


def ms_loss_reference(x, target, alpha=2.0, beta=5.0, margin=0.5, epsilon=0.2):
    """Pure-numpy transcription of the PyTorch forward (m == 1)."""
    x = np.asarray(x, np.float32)
    target = np.asarray(target)
    n = x.shape[0]
    sim = x @ x.T
    temp = []
    for j in range(n):
        row = sim[j]
        pos_ = row[target == target[j]]
        neg_ = row[target != target[j]]
        pos_ = pos_[pos_ < 1]
        if len(pos_) < 1 or len(neg_) < 1:
            continue
        pos_ = np.sort(pos_)
        neg_ = np.sort(neg_)
        neg = neg_[neg_ + epsilon > pos_[0]]
        pos = pos_[pos_ - epsilon < neg_[-1]]
        if len(neg) < 1 or len(pos) < 1:
            continue
        pos_loss = np.log(1 + np.sum(np.exp(-alpha * (pos - margin)))) / alpha
        neg_loss = np.log(1 + np.sum(np.exp(beta * (neg - margin)))) / beta
        temp.append(pos_loss + neg_loss)
    if len(temp) < 1:
        return 0.0
    return float(np.sum(temp) / len(temp))


if __name__ == "__main__":
    key = jax.random.PRNGKey(0)
    n, d = 8, 32  # batch of 8 embeddings, 32-dim features

    kx, _ = jax.random.split(key)
    # Small-magnitude embeddings so similarities stay well away from the
    # `sim < 1` threshold.  Pre-quantize to bf16 values so the bf16-fed MXU
    # path and the f32 numpy reference see identical inputs.
    x = (0.1 * jax.random.normal(kx, (n, d), dtype=jnp.float32))
    x = x.astype(jnp.bfloat16).astype(jnp.float32)
    target = jnp.array([0, 0, 1, 1, 2, 2, 3, 3], dtype=jnp.int32)

    loss = ms_loss_pallas(x, target)
    loss = jax.block_until_ready(loss)

    ref = ms_loss_reference(np.asarray(x), np.asarray(target))
    assert np.isfinite(float(loss)), "kernel produced non-finite loss"
    assert np.allclose(float(loss), ref, rtol=1e-4, atol=1e-5), (float(loss), ref)

    print("KERNEL_OK")
</pallas_src>

<mosaic_0001>
module attributes {stable_mosaic.version = 11 : i64} {
  func.func @ms_loss_kernel(%arg0: i32, %arg1: memref<8x32xbf16, #tpu.memory_space<vmem>>, %arg2: memref<1x8xi32, #tpu.memory_space<vmem>>, %arg3: memref<8x1xi32, #tpu.memory_space<vmem>>, %arg4: memref<8x1xf32, #tpu.memory_space<vmem>>, %arg5: memref<8x1xf32, #tpu.memory_space<vmem>>) attributes {dimension_semantics = [#tpu.dimension_semantics<parallel>], iteration_bounds = array<i64: 1>, scalar_prefetch = 0 : i64, scratch_operands = 0 : i64, tpu.core_type = #tpu.core_type<tc>, window_params = [{pipeline_mode = #tpu.pipeline_mode<synchronous>, transform_indices = @transform_0, window_bounds = array<i64: 8, 32>}, {pipeline_mode = #tpu.pipeline_mode<synchronous>, transform_indices = @transform_1, window_bounds = array<i64: 1, 8>}, {transform_indices = @transform_2, window_bounds = array<i64: 8, 1>}, {transform_indices = @transform_3, window_bounds = array<i64: 8, 1>}, {transform_indices = @transform_4, window_bounds = array<i64: 8, 1>}]} {
    %c8_i32 = arith.constant 8 : i32
    %0 = arith.muli %arg0, %c8_i32 : i32
    %1 = tpu.assume_multiple %0, 8 : i32
    %c0 = arith.constant 0 : index
    %c0_0 = arith.constant 0 : index
    %2 = vector.load %arg1[%c0, %c0_0] : memref<8x32xbf16, #tpu.memory_space<vmem>>, vector<8x32xbf16>
    %3 = arith.index_cast %1 : i32 to index
    %c0_1 = arith.constant 0 : index
    %4 = vector.load %arg1[%3, %c0_1] : memref<8x32xbf16, #tpu.memory_space<vmem>>, vector<8x32xbf16>
    %cst = arith.constant dense<0.000000e+00> : vector<8x8xf32>
    %5 = tpu.matmul %4, %2, %cst {dimension_numbers = #tpu.dot_dimension_numbers<[1], [1], [0], [0], [0, 0, 1, 0], [], []>} : vector<8x32xbf16>, vector<8x32xbf16>, vector<8x8xf32> -> vector<8x8xf32>
    %c0_2 = arith.constant 0 : index
    %c0_3 = arith.constant 0 : index
    %6 = vector.load %arg2[%c0_2, %c0_3] : memref<1x8xi32, #tpu.memory_space<vmem>>, vector<1x8xi32>
    %c0_4 = arith.constant 0 : index
    %c0_5 = arith.constant 0 : index
    %7 = vector.load %arg3[%c0_4, %c0_5] : memref<8x1xi32, #tpu.memory_space<vmem>>, vector<8x1xi32>
    %8 = vector.broadcast %7 : vector<8x1xi32> to vector<8x8xi32>
    %9 = vector.broadcast %6 : vector<1x8xi32> to vector<8x8xi32>
    %10 = arith.cmpi eq, %8, %9 : vector<8x8xi32>
    %11 = tpu.iota {dimensions = array<i32: 1>} : vector<1x8xi32>
    %c8_i32_6 = arith.constant 8 : i32
    %12 = vector.broadcast %c8_i32_6 : i32 to vector<1x8xi32>
    %13 = arith.cmpi slt, %11, %12 : vector<1x8xi32>
    %cst_7 = arith.constant 1.000000e+00 : f32
    %14 = vector.broadcast %cst_7 : f32 to vector<8x8xf32>
    %15 = arith.cmpf olt, %5, %14 : vector<8x8xf32>
    %16 = arith.andi %10, %15 : vector<8x8xi1>
    %17 = vector.broadcast %13 : vector<1x8xi1> to vector<8x8xi1>
    %18 = arith.andi %16, %17 : vector<8x8xi1>
    %cst_8 = arith.constant dense<true> : vector<8x8xi1>
    %19 = arith.xori %10, %cst_8 : vector<8x8xi1>
    %20 = vector.broadcast %13 : vector<1x8xi1> to vector<8x8xi1>
    %21 = arith.andi %19, %20 : vector<8x8xi1>
    %cst_9 = arith.constant 0x7F800000 : f32
    %22 = vector.broadcast %cst_9 : f32 to vector<8x8xf32>
    %23 = arith.select %18, %5, %22 : vector<8x8xi1>, vector<8x8xf32>
    %cst_10 = arith.constant dense<0x7F800000> : vector<8xf32>
    %24 = vector.multi_reduction <minimumf>, %23, %cst_10 [1] : vector<8x8xf32> to vector<8xf32>
    %25 = vector.shape_cast %24 : vector<8xf32> to vector<8x1xf32>
    %cst_11 = arith.constant 0.000000e+00 : f32
    %cst_12 = arith.constant 0x7F800000 : f32
    %26 = arith.subf %cst_11, %cst_12 : f32
    %27 = vector.broadcast %26 : f32 to vector<8x8xf32>
    %28 = arith.select %21, %5, %27 : vector<8x8xi1>, vector<8x8xf32>
    %cst_13 = arith.constant dense<0xFF800000> : vector<8xf32>
    %29 = vector.multi_reduction <maximumf>, %28, %cst_13 [1] : vector<8x8xf32> to vector<8xf32>
    %30 = vector.shape_cast %29 : vector<8xf32> to vector<8x1xf32>
    %cst_14 = arith.constant 2.000000e-01 : f32
    %31 = vector.broadcast %cst_14 : f32 to vector<8x8xf32>
    %32 = arith.subf %5, %31 : vector<8x8xf32>
    %33 = vector.broadcast %30 : vector<8x1xf32> to vector<8x8xf32>
    %34 = arith.cmpf olt, %32, %33 : vector<8x8xf32>
    %35 = arith.andi %18, %34 : vector<8x8xi1>
    %cst_15 = arith.constant 2.000000e-01 : f32
    %36 = vector.broadcast %cst_15 : f32 to vector<8x8xf32>
    %37 = arith.addf %5, %36 : vector<8x8xf32>
    %38 = vector.broadcast %25 : vector<8x1xf32> to vector<8x8xf32>
    %39 = arith.cmpf ogt, %37, %38 : vector<8x8xf32>
    %40 = arith.andi %21, %39 : vector<8x8xi1>
    %cst_16 = arith.constant 5.000000e-01 : f32
    %41 = vector.broadcast %cst_16 : f32 to vector<8x8xf32>
    %42 = arith.subf %5, %41 : vector<8x8xf32>
    %cst_17 = arith.constant -2.000000e+00 : f32
    %43 = vector.broadcast %cst_17 : f32 to vector<8x8xf32>
    %44 = arith.mulf %43, %42 : vector<8x8xf32>
    %cst_18 = arith.constant 0.000000e+00 : f32
    %cst_19 = arith.constant 0x7F800000 : f32
    %45 = arith.subf %cst_18, %cst_19 : f32
    %46 = vector.broadcast %45 : f32 to vector<8x8xf32>
    %47 = arith.select %35, %44, %46 : vector<8x8xi1>, vector<8x8xf32>
    %48 = math.exp %47 : vector<8x8xf32>
    %cst_20 = arith.constant 5.000000e+00 : f32
    %49 = vector.broadcast %cst_20 : f32 to vector<8x8xf32>
    %50 = arith.mulf %49, %42 : vector<8x8xf32>
    %cst_21 = arith.constant 0.000000e+00 : f32
    %cst_22 = arith.constant 0x7F800000 : f32
    %51 = arith.subf %cst_21, %cst_22 : f32
    %52 = vector.broadcast %51 : f32 to vector<8x8xf32>
    %53 = arith.select %40, %50, %52 : vector<8x8xi1>, vector<8x8xf32>
    %54 = math.exp %53 : vector<8x8xf32>
    %cst_23 = arith.constant dense<0.000000e+00> : vector<8xf32>
    %55 = vector.multi_reduction <add>, %48, %cst_23 [1] : vector<8x8xf32> to vector<8xf32>
    %56 = vector.shape_cast %55 : vector<8xf32> to vector<8x1xf32>
    %cst_24 = arith.constant dense<0.000000e+00> : vector<8xf32>
    %57 = vector.multi_reduction <add>, %54, %cst_24 [1] : vector<8x8xf32> to vector<8xf32>
    %58 = vector.shape_cast %57 : vector<8xf32> to vector<8x1xf32>
    %59 = tpu.iota {dimensions = array<i32: 0>} : vector<8x1xi32>
    %60 = vector.broadcast %1 : i32 to vector<8x1xi32>
    %61 = arith.addi %60, %59 : vector<8x1xi32>
    %cst_25 = arith.constant 0.000000e+00 : f32
    %62 = vector.broadcast %cst_25 : f32 to vector<8x1xf32>
    %63 = arith.cmpf ogt, %56, %62 : vector<8x1xf32>
    %cst_26 = arith.constant 0.000000e+00 : f32
    %64 = vector.broadcast %cst_26 : f32 to vector<8x1xf32>
    %65 = arith.cmpf ogt, %58, %64 : vector<8x1xf32>
    %66 = arith.andi %63, %65 : vector<8x1xi1>
    %c8_i32_27 = arith.constant 8 : i32
    %67 = vector.broadcast %c8_i32_27 : i32 to vector<8x1xi32>
    %68 = arith.cmpi slt, %61, %67 : vector<8x1xi32>
    %69 = arith.andi %66, %68 : vector<8x1xi1>
    %cst_28 = arith.constant 1.000000e+00 : f32
    %70 = vector.broadcast %cst_28 : f32 to vector<8x1xf32>
    %71 = arith.addf %70, %56 : vector<8x1xf32>
    %72 = math.log %71 : vector<8x1xf32>
    %cst_29 = arith.constant 5.000000e-01 : f32
    %73 = vector.broadcast %cst_29 : f32 to vector<8x1xf32>
    %74 = arith.mulf %72, %73 : vector<8x1xf32>
    %cst_30 = arith.constant 1.000000e+00 : f32
    %75 = vector.broadcast %cst_30 : f32 to vector<8x1xf32>
    %76 = arith.addf %75, %58 : vector<8x1xf32>
    %77 = math.log %76 : vector<8x1xf32>
    %cst_31 = arith.constant 2.000000e-01 : f32
    %78 = vector.broadcast %cst_31 : f32 to vector<8x1xf32>
    %79 = arith.mulf %77, %78 : vector<8x1xf32>
    %80 = arith.addf %74, %79 : vector<8x1xf32>
    %cst_32 = arith.constant 0.000000e+00 : f32
    %81 = vector.broadcast %cst_32 : f32 to vector<8x1xf32>
    %82 = arith.select %69, %80, %81 : vector<8x1xi1>, vector<8x1xf32>
    %c0_33 = arith.constant 0 : index
    %c0_34 = arith.constant 0 : index
    %83 = vector.load %arg4[%c0_33, %c0_34] : memref<8x1xf32, #tpu.memory_space<vmem>>, vector<8x1xf32>
    tpu.vector_store %arg4[%c0_33, %c0_34], %82 {strides = array<i32>} : memref<8x1xf32, #tpu.memory_space<vmem>>, vector<8x1xf32>,
    %84 = arith.extui %69 : vector<8x1xi1> to vector<8x1xi32>
    %85 = arith.sitofp %84 : vector<8x1xi32> to vector<8x1xf32>
    %c0_35 = arith.constant 0 : index
    %c0_36 = arith.constant 0 : index
    %86 = vector.load %arg5[%c0_35, %c0_36] : memref<8x1xf32, #tpu.memory_space<vmem>>, vector<8x1xf32>
    tpu.vector_store %arg5[%c0_35, %c0_36], %85 {strides = array<i32>} : memref<8x1xf32, #tpu.memory_space<vmem>>, vector<8x1xf32>,
    return
  }
  func.func @transform_0(%arg0: i32) -> (i32, i32) {
    %c0_i32 = arith.constant 0 : i32
    %c0_i32_0 = arith.constant 0 : i32
    %c0_i32_1 = arith.constant 0 : i32
    return %c0_i32, %c0_i32_0 : i32, i32
  }
  func.func @transform_1(%arg0: i32) -> (i32, i32) {
    %c0_i32 = arith.constant 0 : i32
    %c0_i32_0 = arith.constant 0 : i32
    %c0_i32_1 = arith.constant 0 : i32
    return %c0_i32, %c0_i32_0 : i32, i32
  }
  func.func @transform_2(%arg0: i32) -> (i32, i32) {
    %c0_i32 = arith.constant 0 : i32
    %c0_i32_0 = arith.constant 0 : i32
    return %arg0, %c0_i32 : i32, i32
  }
  func.func @transform_3(%arg0: i32) -> (i32, i32) {
    %c0_i32 = arith.constant 0 : i32
    %c0_i32_0 = arith.constant 0 : i32
    return %arg0, %c0_i32 : i32, i32
  }
  func.func @transform_4(%arg0: i32) -> (i32, i32) {
    %c0_i32 = arith.constant 0 : i32
    %c0_i32_0 = arith.constant 0 : i32
    return %arg0, %c0_i32 : i32, i32
  }
}

</mosaic_0001>

<bundles_post_ra>
// kernel: tpu_custom_call.1
= control target key start
LH: loop header
LB: loop body
LE: loop exit
PB: predicated region body
PF: predicated region fallthrough
CT: control target
= control target key end

     0   :  { %vm24_vm0 = vcmask 261120   ;;  %v181_v0 = vmov 0.0   ;;  %vm182_vm1 = vmmov 0   ;;  %v183_v4 = vmov 0   ;;  %s245_s0 = inlined_call_operand.vmem [shape: bf16[8,32], index: 0, kind: input, shape index: {}]   ;;  %s246_s2 = inlined_call_operand.vmem [shape: s32[8,1], index: 2, kind: input, shape index: {}]   ;;  %s247_s1 = inlined_call_operand.vmem [shape: s32[1,8], index: 1, kind: input, shape index: {}]   ;;  %s248_s4 = inlined_call_operand.vmem [shape: f32[8,1], index: 4, kind: output, shape index: {1}]   ;;  %s249_s3 = inlined_call_operand.vmem [shape: f32[8,1], index: 3, kind: output, shape index: {0}]  }
   0x1   :  { %162 = vmatprep.subr.bf16.mxu0 %v181_v0  ;;  %v18_v1 = vld [vmem:[%s245_s0] sm:$0xf]  ;;  %164 = vmatprep.mubr.msk.bf16.mxu0 %vm182_vm1, %v181_v0  ;;  %v81_v6 = vlaneseq  ;;  %vm184_vm3 = vmmov 1   ;;  %vm92_vm7 = vcmask 64512  }
   0x2   :  { %v72_v2 = vld [vmem:[%s246_s2] sm:$0xff]  ;;  %v29_v3 = vsel %vm24_vm0, %v18_v1, 0  ;;  %172 = vset.pattern.permute.xlu0 %v183_v4 }
   0x3   :  { %163 = vmatpush3.bf16.xpose.msra.mxu0 %v29_v3  ;;  %74 = vperm.xlu0 %172, %v72_v2   ;;  %v23_v5 = vld [vmem:[%s245_s0] sm:$0xf]  ;;  %v82_v9 = vand.u32 127, %v81_v6 }
   0x4   :  { %v156_v8 = vld [vmem:[%s247_s1] ss:$0 sm:$0xff] }
   0x5   :  { %vm83_vm5 = vcmp.lt.s32.totalorder %v82_v9, 8 }
   0xa   :  { %165 = vmatmul.mubr.msk.bf16.vlgmr.msra.gmra.mxu0 %vm24_vm0, %v23_v5  ;;  %vm140_vm0 = vcmask 7168  }
  0x7e   :  { %v75_v7 = vpop.permute.xlu0 %74 }
  0x7f   :  { %vm80_vm2 = vcmp.eq.s32.totalorder %v75_v7, %v156_v8 }
  0x80   :  { %vm89_vm4 = vmxor %vm80_vm2, %vm184_vm3 }
  0x81   :  { %vm224_vm6 = vmand %vm89_vm4, %vm83_vm5 }
  0xca   :  { %v65_v11 = vpop.f32.mrf.mxu0 }
  0xcb   :  { %v96_v12 = vsel %vm224_vm6, %v65_v11, -inf  ;;  %vm84_vm8 = vcmp.lt.f32.partialorder %v65_v11, 1.0  ;;  %v158_v19 = vadd.f32 -0.5, %v65_v11  ;;  %v157_v20 = vadd.f32 -0.2, %v65_v11 }
  0xcc   :  { %v166_v13 = vpop.f32.mrf.mxu0  ;;  %v97_v14 = vsel %vm92_vm7, %v96_v12, -inf  ;;  %vm85_vm9 = vmand %vm80_vm2, %vm84_vm8  ;;  %v103_v23 = vadd.f32 0.2, %v65_v11 }
  0xcd   :  { %98 = vmax.xlane.f32.xlu1 %v97_v14  ;;  %vm88_vm10 = vmand %vm85_vm9, %vm83_vm5  ;;  %v107_v22 = vmul.f32 -2.0, %v158_v19  ;;  %v111_v27 = vmul.f32 5.0, %v158_v19 }
  0xce   :  { %v68_v15 = vpop.f32.mrf.mxu0  ;;  %v91_v16 = vsel %vm88_vm10, %v65_v11, inf }
  0xcf   :  { %v93_v17 = vsel %vm92_vm7, %v91_v16, inf }
  0xd0   :  { %94 = vmin.xlane.f32.xlu0 %v93_v17  ;;  %v167_v18 = vpop.f32.mrf.mxu0 }
 0x156   :  { %v99_v21 = vpop.xlane.xlu1 %98 }
 0x157   :  { %vm101_vm11 = vcmp.lt.f32.partialorder %v157_v20, %v99_v21 }
 0x158   :  { %vm102_vm12 = vmand %vm88_vm10, %vm101_vm11 }
 0x159   :  { %v108_v24 = vsel %vm102_vm12, %v107_v22, -inf  ;;  %v95_v25 = vpop.xlane.xlu0 %94 }
 0x15a   :  { %v109_v26 = vmul.f32 1.442695, %v108_v24  ;;  %vm104_vm13 = vcmp.gt.f32.partialorder %v103_v23, %v95_v25 }
 0x15b   :  { %vm105_vm14 = vmand %vm224_vm6, %vm104_vm13 }
 0x15c   :  { %173 = vpow2.f32 %v109_v26  ;;  %v112_v28 = vsel %vm105_vm14, %v111_v27, -inf }
 0x15d   :  { %v113_v29 = vmul.f32 1.442695, %v112_v28 }
 0x15f   :  { %175 = vpow2.f32 %v113_v29 }
 0x169   :  { %v174_v30 = vpop.eup %173 }
 0x16a   :  { %v115_v31 = vsel %vm92_vm7, %v174_v30, 0.0 }
 0x16b   :  { %116 = vadd.xlane.f32.xlu1 %v115_v31 }
 0x16c   :  { %v176_v32 = vpop.eup %175 }
 0x16d   :  { %v118_v33 = vsel %vm92_vm7, %v176_v32, 0.0 }
 0x16f   :  { %119 = vadd.xlane.f32.xlu1 %v118_v33 }
 0x1f4   :  { %v117_v34 = vpop.xlane.xlu1 %116 }
 0x1f5   :  { %v130_v35 = vadd.f32 1.0, %v117_v34  ;;  %vm125_vm15 = vcmp.gt.f32.partialorder %v117_v34, 0.0 }
 0x1f7   :  { %177 = vlog2.f32 %v130_v35 }
 0x1f8   :  { %v120_v36 = vpop.xlane.xlu1 %119 }
 0x1f9   :  { %vm126_vm1 = vcmp.gt.f32.partialorder %v120_v36, 0.0  ;;  %v134_v37 = vadd.f32 1.0, %v120_v36 }
 0x1fa   :  { %vm127_vm2 = vmand %vm125_vm15, %vm126_vm1 }
 0x1fb   :  { %179 = vlog2.f32 %v134_v37  ;;  %v159_v38 = vsel %vm127_vm2, 1.0, %v181_v0 }
 0x1fc   :  { %144 = vst.msk [vmem:[%s248_s4] sm:$0xff] %vm140_vm0, %v159_v38 }
 0x204   :  { %v178_v39 = vpop.eup %177 }
 0x205   :  { %v132_v40 = vmul.f32 0.6931472, %v178_v39 }
 0x207   :  { %v133_v43 = vmul.f32 0.5, %v132_v40 }
 0x208   :  { %v180_v41 = vpop.eup %179 }
 0x209   :  { %v136_v42 = vmul.f32 0.6931472, %v180_v41 }
 0x20b   :  { %v137_v44 = vmul.f32 0.2, %v136_v42 }
 0x20d   :  { %v138_v45 = vadd.f32 %v137_v44, %v133_v43 }
 0x20f   :  { %v139_v46 = vsel %vm127_vm2, %v138_v45, 0.0 }
 0x210   :  { %141 = vst.msk [vmem:[%s249_s3] sm:$0xff] %vm140_vm0, %v139_v46 }

</bundles_post_ra>
